<compile_context>
chip_gen: v7x
topology: tpu7x:2x2x1
jax: 0.10.0
libtpu: 0.0.40
codegen_flags: <defaults>
</compile_context>

<pallas_src>
import functools

import jax
import jax.numpy as jnp
from jax import lax
from jax.experimental import pallas as pl
from jax.experimental.pallas import tpu as pltpu

_NEG = -1e30  # finite "-inf" for padded logit columns (exp underflows to 0)


def _round_up(n, m):
    return ((n + m - 1) // m) * m


# ---------------------------------------------------------------------------
# Kernel 1: hoisted input projection  zx = x @ [Wxh | Wxo] + [bh | bo]
# ---------------------------------------------------------------------------
def input_proj_kernel(x_ref, wx_ref, b_ref, zxh_ref, zxo_ref, *, hp):
    # x_ref : (TT*B, I)   streamed        wx_ref: (I, Hp+Op) resident
    # b_ref : (1, Hp+Op)  resident
    z = jnp.dot(x_ref[...], wx_ref[...],
                preferred_element_type=jnp.float32) + b_ref[...]
    zxh_ref[...] = z[:, :hp]     # lane-aligned split (hp is a multiple of 128)
    zxo_ref[...] = z[:, hp:]


# ---------------------------------------------------------------------------
# Kernel 2: the serial recurrence (only  h <- zxh_t + h @ Whh  per step)
# ---------------------------------------------------------------------------
def rnn_recurrent_kernel(zxh_ref, whh_ref, h0_ref, hprev_ref, hlast_ref, *, tt):
    # zxh_ref : (TT, B, Hp) streamed      whh_ref: (Hp, Hp) resident
    # h0_ref  : (B, Hp)     resident
    # hprev_ref: (TT, B, Hp) streamed out (hprev[t] = hidden consumed by step t)
    # hlast_ref: (B, Hp)     resident carry (constant index_map)
    blk = pl.program_id(0)

    @pl.when(blk == 0)
    def _():
        hlast_ref[...] = h0_ref[...]

    whh = whh_ref[...]  # hoisted load, stays in vregs across the unrolled loop

    def body(i, h):
        hprev_ref[i] = h
        return zxh_ref[i] + jnp.dot(h, whh, preferred_element_type=jnp.float32)

    h = lax.fori_loop(0, tt, body, hlast_ref[...], unroll=True)
    hlast_ref[...] = h


# ---------------------------------------------------------------------------
# Kernel 3: output head + log-softmax (fully parallel over time blocks)
# ---------------------------------------------------------------------------
def output_head_kernel(zxo_ref, hprev_ref, who_ref, lp_ref):
    # zxo_ref : (TT*B, Op)  hprev_ref: (TT*B, Hp)  who_ref: (Hp, Op)
    logits = zxo_ref[...] + jnp.dot(hprev_ref[...], who_ref[...],
                                    preferred_element_type=jnp.float32)
    m = jnp.max(logits, axis=-1, keepdims=True)
    s = logits - m
    lse = jnp.log(jnp.sum(jnp.exp(s), axis=-1, keepdims=True))
    lp_ref[...] = s - lse


# ---------------------------------------------------------------------------
# Parameter fusion (done once)
# ---------------------------------------------------------------------------
def fuse_params(w_i2h, b_i2h, w_i2o, b_i2o, input_size):
    """Pre-transpose, split input/hidden parts, fuse heads, lane-pad.

    w_i2h: (H, I+H)  b_i2h: (H,)      w_i2o: (O, I+H)  b_i2o: (O,)
    """
    H = w_i2h.shape[0]
    O = w_i2o.shape[0]
    I = input_size
    assert w_i2h.shape[1] == I + H and w_i2o.shape[1] == I + H

    Hp = _round_up(H, 128)
    Op = _round_up(O, 128)

    w_i2h_t = w_i2h.T.astype(jnp.float32)   # (I+H, H)
    w_i2o_t = w_i2o.T.astype(jnp.float32)   # (I+H, O)

    wxh = jnp.pad(w_i2h_t[:I], ((0, 0), (0, Hp - H)))          # (I, Hp)  zeros
    wxo = jnp.pad(w_i2o_t[:I], ((0, 0), (0, Op - O)))          # (I, Op)  zeros
    whh = jnp.pad(w_i2h_t[I:], ((0, Hp - H), (0, Hp - H)))     # (Hp, Hp) zeros
    who = jnp.pad(w_i2o_t[I:], ((0, Hp - H), (0, Op - O)))     # (Hp, Op) zeros

    bh = jnp.pad(b_i2h.astype(jnp.float32), (0, Hp - H))                 # zeros
    bo = jnp.pad(b_i2o.astype(jnp.float32), (0, Op - O),
                 constant_values=_NEG)                                   # -1e30
    b = jnp.concatenate([bh, bo]).reshape(1, Hp + Op)

    wx = jnp.concatenate([wxh, wxo], axis=1)                   # (I, Hp+Op)

    return {"wx": wx, "whh": whh, "who": who, "b": b,
            "I": I, "H": H, "O": O, "Hp": Hp, "Op": Op}


# ---------------------------------------------------------------------------
# Wrapper: full sequence, three pallas_calls
# ---------------------------------------------------------------------------
def rnn_forward_seq(xs, h0, params, *, tt=8):
    """xs: (T, B, I), h0: (B, H) -> (log_probs (T, B, O), final hidden (B, H))."""
    T, B, I = xs.shape
    H, O, Hp, Op = params["H"], params["O"], params["Hp"], params["Op"]
    Np = Hp + Op
    assert I == params["I"]

    Bp = _round_up(max(B, 8), 8)           # sublane fill (raise B for MXU fill)
    Tp = _round_up(max(T, tt), tt)         # time padded to a multiple of TT
    n_blk = Tp // tt

    xs_p = jnp.pad(xs.astype(jnp.float32), ((0, Tp - T), (0, Bp - B), (0, 0)))
    h0_p = jnp.pad(h0.astype(jnp.float32), ((0, Bp - B), (0, Hp - H)))
    xs2 = xs_p.reshape(Tp * Bp, I)         # contiguous reshape: free in XLA

    # --- 1. hoisted input projection (parallel) ----------------------------
    zxh2, zxo2 = pl.pallas_call(
        functools.partial(input_proj_kernel, hp=Hp),
        grid=(n_blk,),
        in_specs=[
            pl.BlockSpec((tt * Bp, I), lambda t: (t, 0)),     # x      (streamed)
            pl.BlockSpec((I, Np), lambda t: (0, 0)),          # Wx     (resident)
            pl.BlockSpec((1, Np), lambda t: (0, 0)),          # bias   (resident)
        ],
        out_specs=(
            pl.BlockSpec((tt * Bp, Hp), lambda t: (t, 0)),
            pl.BlockSpec((tt * Bp, Op), lambda t: (t, 0)),
        ),
        out_shape=(
            jax.ShapeDtypeStruct((Tp * Bp, Hp), jnp.float32),
            jax.ShapeDtypeStruct((Tp * Bp, Op), jnp.float32),
        ),
        compiler_params=pltpu.CompilerParams(
            dimension_semantics=("parallel",)),
    )(xs2, params["wx"], params["b"])

    # --- 2. serial recurrence (TT timesteps per grid step) ------------------
    hprev, hlast = pl.pallas_call(
        functools.partial(rnn_recurrent_kernel, tt=tt),
        grid=(n_blk,),
        in_specs=[
            pl.BlockSpec((tt, Bp, Hp), lambda t: (t, 0, 0)),  # zxh_t (streamed)
            pl.BlockSpec((Hp, Hp), lambda t: (0, 0)),         # Whh   (resident)
            pl.BlockSpec((Bp, Hp), lambda t: (0, 0)),         # h0    (resident)
        ],
        out_specs=(
            pl.BlockSpec((tt, Bp, Hp), lambda t: (t, 0, 0)),  # hprev per step
            pl.BlockSpec((Bp, Hp), lambda t: (0, 0)),         # hidden carry
        ),
        out_shape=(
            jax.ShapeDtypeStruct((Tp, Bp, Hp), jnp.float32),
            jax.ShapeDtypeStruct((Bp, Hp), jnp.float32),
        ),
        compiler_params=pltpu.CompilerParams(
            dimension_semantics=("arbitrary",)),
    )(zxh2.reshape(Tp, Bp, Hp), params["whh"], h0_p)

    # --- 3. output head + log-softmax (parallel) -----------------------------
    lp2 = pl.pallas_call(
        output_head_kernel,
        grid=(n_blk,),
        in_specs=[
            pl.BlockSpec((tt * Bp, Op), lambda t: (t, 0)),    # zxo_t  (streamed)
            pl.BlockSpec((tt * Bp, Hp), lambda t: (t, 0)),    # hprev  (streamed)
            pl.BlockSpec((Hp, Op), lambda t: (0, 0)),         # Who    (resident)
        ],
        out_specs=pl.BlockSpec((tt * Bp, Op), lambda t: (t, 0)),
        out_shape=jax.ShapeDtypeStruct((Tp * Bp, Op), jnp.float32),
        compiler_params=pltpu.CompilerParams(
            dimension_semantics=("parallel",)),
    )(zxo2, hprev.reshape(Tp * Bp, Hp), params["who"])

    log_probs = lp2.reshape(Tp, Bp, Op)[:T, :B, :O]
    if Tp > T:
        # step T was executed as a padded step; hprev[T] = hidden after T steps
        h_final = hprev[T, :B, :H]
    else:
        h_final = hlast[:B, :H]
    return log_probs, h_final


def rnn_forward(x, hidden, params, *, tt=8):
    """Single step, matching the PyTorch module's forward()."""
    lp, h = rnn_forward_seq(x[None], hidden, params, tt=tt)
    return lp[0], h


if __name__ == "__main__":
    # Small shapes consistent with the module (B >= 8 fills one sublane tile).
    B, I, H, O, T = 8, 16, 32, 10, 12   # T=12 with TT=8 exercises time padding

    key = jax.random.PRNGKey(0)
    k1, k2, k3, k4, k5 = jax.random.split(key, 5)

    bound = float((I + H) ** -0.5)  # PyTorch-Linear-like uniform scale
    w_i2h = jax.random.uniform(k1, (H, I + H), jnp.float32, -bound, bound)
    b_i2h = jax.random.uniform(k2, (H,), jnp.float32, -bound, bound)
    w_i2o = jax.random.uniform(k3, (O, I + H), jnp.float32, -bound, bound)
    b_i2o = jax.random.uniform(k4, (O,), jnp.float32, -bound, bound)

    xs = jax.random.normal(k5, (T, B, I), jnp.float32)
    h0 = jnp.zeros((B, H), jnp.float32)  # self.hidden after init()

    params = fuse_params(w_i2h, b_i2h, w_i2o, b_i2o, I)

    log_probs, h_final = jax.block_until_ready(
        rnn_forward_seq(xs, h0, params, tt=8))

    # Pure-JAX reference: repeated application of the module's forward().
    def ref_step(h, x):
        comb = jnp.concatenate([x, h], axis=1)
        h_new = comb @ w_i2h.T + b_i2h
        out = jax.nn.log_softmax(comb @ w_i2o.T + b_i2o, axis=1)
        return h_new, out

    h_ref = h0
    ref_outs = []
    for t in range(T):
        h_ref, o_ref = ref_step(h_ref, xs[t])
        ref_outs.append(o_ref)
    ref_lp = jnp.stack(ref_outs)

    assert log_probs.shape == (T, B, O) and h_final.shape == (B, H)
    assert jnp.allclose(log_probs, ref_lp, atol=1e-4, rtol=1e-4), (
        float(jnp.max(jnp.abs(log_probs - ref_lp))))
    assert jnp.allclose(h_final, h_ref, atol=1e-4, rtol=1e-4), (
        float(jnp.max(jnp.abs(h_final - h_ref))))

    # Single-step wrapper (== module.forward semantics).
    lp1, h1 = jax.block_until_ready(rnn_forward(xs[0], h0, params))
    assert jnp.allclose(lp1, ref_outs[0], atol=1e-4, rtol=1e-4)
    assert jnp.allclose(h1, ref_step(h0, xs[0])[0], atol=1e-4, rtol=1e-4)

    print("KERNEL_OK")
</pallas_src>

<mosaic_0001>
module attributes {stable_mosaic.version = 11 : i64} {
  func.func @input_proj_kernel(%arg0: i32, %arg1: memref<64x16xf32, #tpu.memory_space<vmem>>, %arg2: memref<16x256xf32, #tpu.memory_space<vmem>>, %arg3: memref<1x256xf32, #tpu.memory_space<vmem>>, %arg4: memref<64x128xf32, #tpu.memory_space<vmem>>, %arg5: memref<64x128xf32, #tpu.memory_space<vmem>>) attributes {dimension_semantics = [#tpu.dimension_semantics<parallel>], iteration_bounds = array<i64: 2>, scalar_prefetch = 0 : i64, scratch_operands = 0 : i64, tpu.core_type = #tpu.core_type<tc>, window_params = [{transform_indices = @transform_0, window_bounds = array<i64: 64, 16>}, {pipeline_mode = #tpu.pipeline_mode<synchronous>, transform_indices = @transform_1, window_bounds = array<i64: 16, 256>}, {pipeline_mode = #tpu.pipeline_mode<synchronous>, transform_indices = @transform_2, window_bounds = array<i64: 1, 256>}, {transform_indices = @transform_3, window_bounds = array<i64: 64, 128>}, {transform_indices = @transform_4, window_bounds = array<i64: 64, 128>}]} {
    %c0 = arith.constant 0 : index
    %c0_0 = arith.constant 0 : index
    %0 = vector.load %arg1[%c0, %c0_0] : memref<64x16xf32, #tpu.memory_space<vmem>>, vector<64x16xf32>
    %c0_1 = arith.constant 0 : index
    %c0_2 = arith.constant 0 : index
    %1 = vector.load %arg2[%c0_1, %c0_2] : memref<16x256xf32, #tpu.memory_space<vmem>>, vector<16x256xf32>
    %cst = arith.constant dense<0.000000e+00> : vector<64x256xf32>
    %2 = tpu.matmul %0, %1, %cst {dimension_numbers = #tpu.dot_dimension_numbers<[1], [0], [0], [1], [0, 0, 1, 1], [], []>} : vector<64x16xf32>, vector<16x256xf32>, vector<64x256xf32> -> vector<64x256xf32>
    %c0_3 = arith.constant 0 : index
    %c0_4 = arith.constant 0 : index
    %3 = vector.load %arg3[%c0_3, %c0_4] : memref<1x256xf32, #tpu.memory_space<vmem>>, vector<1x256xf32>
    %4 = vector.broadcast %3 : vector<1x256xf32> to vector<64x256xf32>
    %5 = arith.addf %2, %4 : vector<64x256xf32>
    %6 = vector.extract_strided_slice %5 {offsets = [0, 0], sizes = [64, 128], strides = [1, 1]} : vector<64x256xf32> to vector<64x128xf32>
    %c0_5 = arith.constant 0 : index
    %c0_6 = arith.constant 0 : index
    %7 = vector.load %arg4[%c0_5, %c0_6] : memref<64x128xf32, #tpu.memory_space<vmem>>, vector<64x128xf32>
    tpu.vector_store %arg4[%c0_5, %c0_6], %6 {strides = array<i32>} : memref<64x128xf32, #tpu.memory_space<vmem>>, vector<64x128xf32>,
    %8 = vector.extract_strided_slice %5 {offsets = [0, 128], sizes = [64, 128], strides = [1, 1]} : vector<64x256xf32> to vector<64x128xf32>
    %c0_7 = arith.constant 0 : index
    %c0_8 = arith.constant 0 : index
    %9 = vector.load %arg5[%c0_7, %c0_8] : memref<64x128xf32, #tpu.memory_space<vmem>>, vector<64x128xf32>
    tpu.vector_store %arg5[%c0_7, %c0_8], %8 {strides = array<i32>} : memref<64x128xf32, #tpu.memory_space<vmem>>, vector<64x128xf32>,
    return
  }
  func.func @transform_0(%arg0: i32) -> (i32, i32) {
    %c0_i32 = arith.constant 0 : i32
    %c0_i32_0 = arith.constant 0 : i32
    return %arg0, %c0_i32 : i32, i32
  }
  func.func @transform_1(%arg0: i32) -> (i32, i32) {
    %c0_i32 = arith.constant 0 : i32
    %c0_i32_0 = arith.constant 0 : i32
    %c0_i32_1 = arith.constant 0 : i32
    return %c0_i32, %c0_i32_0 : i32, i32
  }
  func.func @transform_2(%arg0: i32) -> (i32, i32) {
    %c0_i32 = arith.constant 0 : i32
    %c0_i32_0 = arith.constant 0 : i32
    %c0_i32_1 = arith.constant 0 : i32
    return %c0_i32, %c0_i32_0 : i32, i32
  }
  func.func @transform_3(%arg0: i32) -> (i32, i32) {
    %c0_i32 = arith.constant 0 : i32
    %c0_i32_0 = arith.constant 0 : i32
    return %arg0, %c0_i32 : i32, i32
  }
  func.func @transform_4(%arg0: i32) -> (i32, i32) {
    %c0_i32 = arith.constant 0 : i32
    %c0_i32_0 = arith.constant 0 : i32
    return %arg0, %c0_i32 : i32, i32
  }
}

</mosaic_0001>

<bundles_post_ra>
// kernel: tpu_custom_call.1
= control target key start
LH: loop header
LB: loop body
LE: loop exit
PB: predicated region body
PF: predicated region fallthrough
CT: control target
= control target key end

     0   :  { %10 = vsyncpa [#allocation3], 0  ;;  %s910_s0 = inlined_call_operand.vmem [shape: f32[128,16], index: 0, kind: input, shape index: {}]   ;;  %s911_s1 = inlined_call_operand.vmem [shape: f32[16,256], index: 1, kind: input, shape index: {}]   ;;  %s912_s2 = inlined_call_operand.vmem [shape: f32[1,256], index: 2, kind: input, shape index: {}]   ;;  %s913_s3 = inlined_call_operand.hbm [shape: f32[128,128], index: 3, kind: output, shape index: {0}]   ;;  %s914_s4 = inlined_call_operand.hbm [shape: f32[128,128], index: 4, kind: output, shape index: {1}]  }
   0x1   :  { %12 = vsyncpa [#allocation3 + $0x1], 0 }
   0x2   :  { %13 = vsyncpa [#allocation5], 0 }
   0x3   :  { %15 = vsyncpa [#allocation5 + $0x1], 0  ;;  %s723_s15 = smov 0   ;;  %s725_s16 = smov 0  }
   0x4   :  { %s727_s17 = smov 0   ;;  %s729_s18 = smov 0  }
   0x5 LB: > { %s744_s19 = sadd.s32 4294967295, %s691_s18   ;;  %s518_s20 = sadd.s32 4294967294, %s691_s18   ;;  %s691_s18 = sphi %s729_s18, %s920_s18   ;;  %s687_s17 = sphi %s727_s17, %s919_s17   ;;  %s683_s16 = sphi %s725_s16, %s918_s16   ;;  %s679_s15 = sphi %s723_s15, %s917_s15  }
   0x6   : > { %s748_s21 = sadd.s32 1, %s691_s18   ;;  %s96_s22 = sadd.s32 1, %s687_s17 }
   0x7   : > { %s93_s23 = ssub.s32 %s691_s18, %s748_s21  ;;  %p106_p0 = scmp.ne.s32.totalorder %s687_s17, %s683_s16 }
   0x8   : > { %p94_p1 = scmp.eq.s32.totalorder %s93_s23, 0  ;;  %p107_p2 = scmp.eq.s32.totalorder %s744_s19, 1 }
   0x9   : > { %p112_p3 = scmp.ne.s32.totalorder %s683_s16, %s679_s15  ;;  %p113_p4 = scmp.eq.s32.totalorder %s518_s20, 1 }
   0xa   : > { %s759_s24 = scalar_select %p94_p1, %s687_s17, %s96_s22  }
   0xb   : > { %p761_p5 = por %p107_p2, %p106_p0  ;;  %p765_p6 = por %p113_p4, %p112_p3 }
   0xc   : > { %p521_p7 = scmp.ge.s32.totalorder %s691_s18, 1  ;;  %p172_p8 = scmp.lt.s32.totalorder %s691_s18, 3 }
   0xe   : > { %p173_p9 = pnand %p521_p7, %p172_p8 }
   0xf   : > { %v220_v0 = vld [vmem:[%s911_s1 + $0x8] sm:$0xff] (!%p173_p9)  ;;  %v222_v1 = vld [vmem:[%s911_s1 + $0x18] sm:$0xff] (!%p173_p9)  ;;  %v219_v2 = vld [vmem:[%s911_s1] sm:$0xff] (!%p173_p9)  ;;  %s524_s7 = sshll.u32 (!%p173_p9), %s744_s19, 3  ;;  %v693_v5 = vmov (!%p173_p9), 0.0   ;;  %vm235_vm0 = vcmask (!%p173_p9), 130048   ;;  %v225_v15 = vlaneseq (!%p173_p9) }
  0x10   : > { %176 = sbr.rel (%p173_p9) target bundleno = 293 (0x125), region = 32  ;;  %v544_v3 = vpack.c.bf16 (!%p173_p9), %v222_v1, %v220_v0  ;;  %v221_v4 = vld [vmem:[%s911_s1 + $0x10] sm:$0xff] (!%p173_p9)  ;;  %324 = vmatprep.mubr.f32.mxu0 (!%p173_p9), %v693_v5  ;;  %348 = vmatprep.mubr.f32.mxu1 (!%p173_p9), %v693_v5  ;;  %p204_p10 = scmp.lt.s32.totalorder (!%p173_p9), %s524_s7, 15  ;;  %v223_v18 = vld [vmem:[%s912_s2] sm:$0x3] (!%p173_p9) }
  0x11   : > { %v546_v6 = vpack.c.bf16 (!%p173_p9), %v221_v4, %v219_v2  ;;  %v226_v16 = vshrl.u32 (!%p173_p9), %v225_v15, 7  ;;  %s796_s14 = sand.u32 (!%p173_p9), 1, %s683_s16   ;;  %s542_s29 = sshll.u32 (!%p173_p9), %s744_s19, 10 }
  0x12   : > { %545 = vmatprep.subr.bf16.mxu0 (!%p173_p9), %v544_v3  ;;  %548 = vmatprep.subr.bf16.mxu1 (!%p173_p9), %v544_v3  ;;  %s522_s23 = sshll.u32 (!%p173_p9), %s796_s14, 6  ;;  %s824_s8 = scalar_lea.hbm (!%p173_p9), %s913_s3, %s542_s29 }
  0x13   : > { %547 = vmatpush1.bf16.msra.mxu0 (!%p173_p9), %v546_v6  ;;  %549 = vmatpush1.bf16.msra.mxu1 (!%p173_p9), %v546_v6  ;;  %v227_v17 = vsub.s32 (!%p173_p9), 0, %v226_v16  ;;  %v231_v19 = vsub.s32 (!%p173_p9), 1, %v226_v16  ;;  %s802_s27 = scalar_lea.vmem (!%p173_p9), [#allocation2], %s522_s23  ;;  %s806_s28 = scalar_lea.vmem (!%p173_p9), [#allocation4], %s522_s23 }
  0x14   : > { %s408_s30 = sshll.u32 (!%p173_p9), %s802_s27, 4  ;;  %s424_s5 = sshll.u32 (!%p173_p9), %s806_s28, 4  ;;  %s826_s30 = int_to_ptr.vmem [resolvable:$true] %s408_s30  ;;  %s833_s5 = int_to_ptr.vmem [resolvable:$true] %s424_s5 }
  0x15   : > { %v228_v20 = vrot.slane (!%p173_p9), %v223_v18, %v227_v17  ;;  %v232_v21 = vrot.slane (!%p173_p9), %v223_v18, %v231_v19  ;;  %s390_s11 = scalar_lea.sflag (!%p173_p9), [#allocation3], %s796_s14  ;;  %s597_s12 = scalar_lea.vmem (!%p173_p9), %s826_s30, 1024 }
  0x16   : > { %p598_p11 = scmp.ne.s32.totalorder (!%p173_p9), %s826_s30, %s597_s12 }
  0x17   : > { %s922_s7 = smov (!%p204_p10, %s524_s7), 15 }
  0x18   : > { %s525_s10 = sshll.u32 %s922_s7, 3  ;;  %p599_p12 = pnand %p598_p11, %p761_p5 }
  0x19   : > { %s207_s13 = scalar_lea.vmem %s910_s0, %s525_s10  ;;  %s831_s10 = scalar_lea.hbm %s914_s4, %s542_s29 }
  0x1a   : > { %v211_v7 = vld [vmem:[%s207_s13] sm:$0xff]  ;;  %v212_v9 = vld [vmem:[%s207_s13 + $0x8] sm:$0xff]  ;;  %v213_v11 = vld [vmem:[%s207_s13 + $0x10] sm:$0xff]  ;;  %p600_p13 = pneg %p599_p12 }
  0x1b   : > { %v215_v8 = vld [vmem:[%s207_s13 + $0x20] sm:$0xff]  ;;  %526 = vmatmul.mubr.msk.f32.vlgmr.msra.gmra.mrb[0].mxu0 %vm235_vm0, %v211_v7  ;;  %v216_v10 = vld [vmem:[%s207_s13 + $0x28] sm:$0xff]  ;;  %v217_v12 = vld [vmem:[%s207_s13 + $0x30] sm:$0xff] }
  0x1c   : > { %530 = vmatmul.mubr.msk.f32.vlgmr.msra.gmra.mrb[0].mxu1 %vm235_vm0, %v215_v8  ;;  %330 = vmatprep.mubr.f32.mxu0 %v693_v5  ;;  %v214_v13 = vld [vmem:[%s207_s13 + $0x18] sm:$0xff] }
  0x1d   : > { %354 = vmatprep.mubr.f32.mxu1 %v693_v5  ;;  %v218_v14 = vld [vmem:[%s207_s13 + $0x38] sm:$0xff]  ;;  %s694_s13 = smov [#allocation2]  }
  0x1e   : > { %s601_s20 = sshll.u32 %s694_s13, 4  ;;  %s602_s20 = int_to_ptr.vmem [resolvable:$false] %s601_s20 }
  0x1f   : > { %527 = vmatmul.mubr.msk.f32.gmra.mrb[2].mxu0 %vm235_vm0, %v212_v9  ;;  %s603_s22 = scalar_lea.vmem %s602_s20, 2048  ;;  %p604_p0 = scmp.lt.s32.totalorder %s826_s30, %s602_s20 }
  0x20   : > { %531 = vmatmul.mubr.msk.f32.gmra.mrb[2].mxu1 %vm235_vm0, %v216_v10  ;;  %336 = vmatprep.mubr.f32.mxu0 %v693_v5  ;;  %p605_p1 = scmp.lt.s32.totalorder %s603_s22, %s597_s12 }
  0x21   : > { %360 = vmatprep.mubr.f32.mxu1 %v693_v5 }
  0x22   : > { %p606_p2 = por %p605_p1, %p604_p0 }
  0x23   : > { %528 = vmatmul.mubr.msk.f32.gmra.mrb[4].mxu0 %vm235_vm0, %v213_v11 }
  0x24   : > { %532 = vmatmul.mubr.msk.f32.gmra.mrb[4].mxu1 %vm235_vm0, %v217_v12  ;;  %342 = vmatprep.mubr.f32.mxu0 %v693_v5  ;;  %p607_p3 = pnand %p606_p2, %p600_p13 }
  0x25   : > { %366 = vmatprep.mubr.f32.mxu1 %v693_v5 }
  0x27   : > { %529 = vmatmul.mubr.msk.f32.gmra.mrb[6].mxu0 %vm235_vm0, %v214_v13 }
  0x28   : > { %533 = vmatmul.mubr.msk.f32.gmra.mrb[6].mxu1 %vm235_vm0, %v218_v14 }
  0xee   : > { %v326_v22 = vpop.f32.mrb[0].mxu0 }
  0xef   : > { %v350_v23 = vpop.f32.mrb[0].mxu1  ;;  %v327_v24 = vadd.f32 %v326_v22, %v228_v20  ;;  %v328_v26 = vpop.f32.mrb[1].mxu0 }
  0xf0   : > { %v351_v25 = vadd.f32 %v350_v23, %v228_v20  ;;  %v352_v27 = vpop.f32.mrb[1].mxu1  ;;  %v329_v28 = vadd.f32 %v328_v26, %v232_v21 }
  0xf1   : > { %v353_v29 = vadd.f32 %v352_v27, %v232_v21  ;;  %373 = vst [vmem:[%s802_s27] sm:$0xff] %v327_v24 }
  0xf2   : > { %377 = vst [vmem:[%s802_s27 + $0x20] sm:$0xff] %v351_v25  ;;  %381 = vst [vmem:[%s806_s28] sm:$0xff] %v329_v28  ;;  %v332_v30 = vpop.f32.mrb[2].mxu0 }
  0xf3   : > { %385 = vst [vmem:[%s806_s28 + $0x20] sm:$0xff] %v353_v29  ;;  %v356_v31 = vpop.f32.mrb[2].mxu1  ;;  %v333_v32 = vadd.f32 %v332_v30, %v228_v20  ;;  %v334_v34 = vpop.f32.mrb[3].mxu0 }
  0xf4   : > { %v357_v33 = vadd.f32 %v356_v31, %v228_v20  ;;  %v358_v35 = vpop.f32.mrb[3].mxu1  ;;  %v335_v36 = vadd.f32 %v334_v34, %v232_v21 }
  0xf5   : > { %v359_v37 = vadd.f32 %v358_v35, %v232_v21  ;;  %374 = vst [vmem:[%s802_s27 + $0x8] sm:$0xff] %v333_v32 }
  0xf6   : > { %378 = vst [vmem:[%s802_s27 + $0x28] sm:$0xff] %v357_v33  ;;  %382 = vst [vmem:[%s806_s28 + $0x8] sm:$0xff] %v335_v36  ;;  %v338_v38 = vpop.f32.mrb[4].mxu0 }
  0xf7   : > { %386 = vst [vmem:[%s806_s28 + $0x28] sm:$0xff] %v359_v37  ;;  %v362_v39 = vpop.f32.mrb[4].mxu1  ;;  %v339_v40 = vadd.f32 %v338_v38, %v228_v20  ;;  %v340_v42 = vpop.f32.mrb[5].mxu0 }
  0xf8   : > { %v363_v41 = vadd.f32 %v362_v39, %v228_v20  ;;  %v364_v43 = vpop.f32.mrb[5].mxu1  ;;  %v341_v44 = vadd.f32 %v340_v42, %v232_v21 }
  0xf9   : > { %v365_v45 = vadd.f32 %v364_v43, %v232_v21  ;;  %375 = vst [vmem:[%s802_s27 + $0x10] sm:$0xff] %v339_v40 }
  0xfa   : > { %379 = vst [vmem:[%s802_s27 + $0x30] sm:$0xff] %v363_v41  ;;  %383 = vst [vmem:[%s806_s28 + $0x10] sm:$0xff] %v341_v44  ;;  %v344_v46 = vpop.f32.mrb[6].mxu0 }
  0xfb   : > { %387 = vst [vmem:[%s806_s28 + $0x30] sm:$0xff] %v365_v45  ;;  %v368_v47 = vpop.f32.mrb[6].mxu1  ;;  %v345_v48 = vadd.f32 %v344_v46, %v228_v20  ;;  %v346_v50 = vpop.f32.mrb[7].mxu0 }
  0xfc   : > { %v369_v49 = vadd.f32 %v368_v47, %v228_v20  ;;  %v370_v51 = vpop.f32.mrb[7].mxu1  ;;  %v347_v52 = vadd.f32 %v346_v50, %v232_v21 }
  0xfd   : > { %v371_v53 = vadd.f32 %v370_v51, %v232_v21  ;;  %376 = vst [vmem:[%s802_s27 + $0x18] sm:$0xff] %v345_v48 }
  0xfe   : > { %380 = vst [vmem:[%s802_s27 + $0x38] sm:$0xff] %v369_v49  ;;  %384 = vst [vmem:[%s806_s28 + $0x18] sm:$0xff] %v347_v52 }
  0xff   : > { %388 = vst [vmem:[%s806_s28 + $0x38] sm:$0xff] %v371_v53 }
 0x100   : > { %610 = shalt.err (!%p607_p3)
}
 0x101   : > { %s611_s23 = scalar_lea.hbm %s824_s8, 1024  ;;  %s615_s29 = scalar_lea.hbm %s913_s3, 2048 }
 0x102   : > { %p612_p4 = scmp.ne.s32.totalorder %s824_s8, %s611_s23  ;;  %p616_p9 = scmp.lt.u32.totalorder %s824_s8, %s913_s3 }
 0x103   : > { %p617_p10 = scmp.lt.u32.totalorder %s615_s29, %s611_s23  ;;  %p619_p12 = scmp.lt.u32.totalorder %s611_s23, %s824_s8 }
 0x104   : > { %p613_p7 = pnand %p612_p4, %p761_p5 }
 0x105   : > { %p618_p11 = por %p617_p10, %p616_p9 }
 0x106   : > { %p614_p8 = pneg %p613_p7 }
 0x107   : > { %p620_p13 = por %p619_p12, %p618_p11 }
 0x109   : > { %p621_p0 = pnand %p620_p13, %p614_p8 }
 0x10b   : > { %624 = shalt.err (!%p621_p0)
}
 0x10c   : > { %s695_s19 = smov 128   ;;  %s696_s9 = smov 8  }
 0x10d   : > { %550 = dma.vmem_to_hbm [thread:$0]  (%p761_p5), %s826_s30, 1024, %s824_s8, %s390_s11, %s695_s19, %s695_s19, %s696_s9  }
 0x10e   : > { %s395_s12 = scalar_lea.sflag [#allocation5], %s796_s14  ;;  %s625_s13 = scalar_lea.vmem %s833_s5, 1024 }
 0x10f   : > { %p626_p1 = scmp.ne.s32.totalorder %s833_s5, %s625_s13  ;;  %s697_s20 = smov [#allocation4]  }
 0x110   : > { %s629_s22 = sshll.u32 %s697_s20, 4  ;;  %s630_s22 = int_to_ptr.vmem [resolvable:$false] %s629_s22 }
 0x111   : > { %p627_p2 = pnand %p626_p1, %p761_p5  ;;  %s631_s23 = scalar_lea.vmem %s630_s22, 2048 }
 0x112   : > { %p632_p4 = scmp.lt.s32.totalorder %s833_s5, %s630_s22  ;;  %p633_p7 = scmp.lt.s32.totalorder %s631_s23, %s625_s13 }
 0x113   : > { %p628_p3 = pneg %p627_p2 }
 0x114   : > { %p634_p8 = por %p633_p7, %p632_p4 }
 0x116   : > { %p635_p9 = pnand %p634_p8, %p628_p3 }
 0x118   : > { %638 = shalt.err (!%p635_p9)
}
 0x119   : > { %s639_s30 = scalar_lea.hbm %s831_s10, 1024  ;;  %s643_s27 = scalar_lea.hbm %s914_s4, 2048 }
 0x11a   : > { %p640_p10 = scmp.ne.s32.totalorder %s831_s10, %s639_s30  ;;  %p644_p13 = scmp.lt.u32.totalorder %s831_s10, %s914_s4 }
 0x11b   : > { %p645_p0 = scmp.lt.u32.totalorder %s643_s27, %s639_s30  ;;  %p647_p2 = scmp.lt.u32.totalorder %s639_s30, %s831_s10 }
 0x11c   : > { %p641_p11 = pnand %p640_p10, %p761_p5 }
 0x11d   : > { %p646_p1 = por %p645_p0, %p644_p13 }
 0x11e   : > { %p642_p12 = pneg %p641_p11 }
 0x11f   : > { %p648_p3 = por %p647_p2, %p646_p1 }
 0x121   : > { %p649_p4 = pnand %p648_p3, %p642_p12 }
 0x123   : > { %652 = shalt.err (!%p649_p4)
}
 0x124   : > { %551 = dma.vmem_to_hbm [thread:$0]  (%p761_p5), %s833_s5, 1024, %s831_s10, %s395_s12, %s695_s19, %s695_s19, %s696_s9  }
 0x125 PF: > { %p561_p7 = scmp.ge.s32.totalorder %s691_s18, 2  ;;  %s439_s6 = sand.u32 1, %s679_s15  }
 0x126   : > { %s440_s7 = scalar_lea.sflag [#allocation3], %s439_s6 }
 0x127   : > { %p555_p8 = pnand %p561_p7, %p765_p6 }
 0x129   : > { %670 = dma.done.wait (!%p555_p8), %s440_s7, 1024  }
 0x12a   : > { %672 = vsyncadd (!%p555_p8), %s440_s7, 4294966272  ;;  %s449_s25 = scalar_lea.sflag [#allocation5], %s439_s6 }
 0x12b   : > { %674 = dma.done.wait (!%p555_p8), %s449_s25, 1024  }
 0x12c   : > { %676 = vsyncadd (!%p555_p8), %s449_s25, 4294966272  ;;  %p18_p5 = scmp.ge.s32.totalorder %s748_s21, 4   ;;  %s917_s15 = smov %s683_s16 }
 0x12d   : > { %s918_s16 = smov %s687_s17  ;;  %s919_s17 = smov %s759_s24 }
 0x12e   : > { %s920_s18 = smov %s748_s21  ;;  %20 = sbr.rel (!%p18_p5) target bundleno = 5 (0x5), region = 84 }
 0x135   :  { %454 = vsyncpa [#allocation3], 1 }
 0x136   :  { %456 = vsyncpa [#allocation3 + $0x1], 1 }
 0x137   :  { %457 = vsyncpa [#allocation5], 1 }
 0x138   :  { %459 = vsyncpa [#allocation5 + $0x1], 1 }

</bundles_post_ra>
